<compile_context>
chip_gen: v7x
topology: tpu7x:2x2x1
jax: 0.10.0
libtpu: 0.0.40
codegen_flags: <defaults>
</compile_context>

<pallas_src>
import math

import numpy as np
import jax
import jax.numpy as jnp
from jax.experimental import pallas as pl
from jax.experimental.pallas import tpu as pltpu


# ---------------------------------------------------------------------------
# Glue: MATLAB-style bicubic resize expressed as a dense (out_len, in_len) matrix.
# ---------------------------------------------------------------------------
def _cubic(x):
    absx = np.abs(x)
    absx2 = absx ** 2
    absx3 = absx ** 3
    f = (1.5 * absx3 - 2.5 * absx2 + 1.0) * (absx <= 1.0)
    f += (-0.5 * absx3 + 2.5 * absx2 - 4.0 * absx + 2.0) * ((absx > 1.0) & (absx <= 2.0))
    return f


def resize_matrix(in_len, out_len, scale):
    """Dense row-resize matrix W so that y = W @ x matches MATLAB imresize (bicubic, antialias)."""
    kernel_width = 4.0
    if scale < 1.0:
        kernel_width /= scale
    x = np.arange(1, out_len + 1, dtype=np.float64)
    u = x / scale + 0.5 * (1.0 - 1.0 / scale)
    left = np.floor(u - kernel_width / 2.0)
    p = int(math.ceil(kernel_width)) + 2
    indices = left[:, None] + np.arange(p, dtype=np.float64)[None, :]  # 1-based
    if scale < 1.0:
        weights = scale * _cubic(scale * (u[:, None] - indices))
    else:
        weights = _cubic(u[:, None] - indices)
    weights = weights / np.sum(weights, axis=1, keepdims=True)
    # symmetric boundary handling (MATLAB `aux` trick), converted to 0-based indices
    aux = np.concatenate([np.arange(in_len), np.arange(in_len)[::-1]])
    idx0 = aux[np.mod(indices.astype(np.int64) - 1, 2 * in_len)]
    w = np.zeros((out_len, in_len), dtype=np.float64)
    for i in range(out_len):
        for j in range(p):
            w[i, idx0[i, j]] += weights[i, j]
    return w.astype(np.float32)


# ---------------------------------------------------------------------------
# Hardware introspection (best-effort, with safe fallbacks).
# ---------------------------------------------------------------------------
def _tpu_hw():
    """Returns (vmem_capacity_bytes, tensorcores_per_device)."""
    vmem_bytes = 128 * 2 ** 20
    n_cores = 1
    try:
        info = pltpu.get_tpu_info()
        vmem_bytes = int(getattr(info, "vmem_capacity_bytes", vmem_bytes))
    except Exception:
        pass
    try:
        kind = jax.devices()[0].device_kind.lower()
        if ("v4" in kind) or ("v5p" in kind) or ("v7" in kind) or ("7x" in kind):
            n_cores = 2                       # megacore / 2-TC parts
        if ("v7" in kind) or ("7x" in kind):
            vmem_bytes = min(vmem_bytes, 64 * 2 ** 20)   # v7x: 64 MiB per TensorCore
    except Exception:
        pass
    return vmem_bytes, n_cores


# ---------------------------------------------------------------------------
# Pallas kernel.
# ---------------------------------------------------------------------------
def _make_kernel(inv_count, b_total, tb, h, w, ho, wo, steps, compute_dtype, needs_mask):
    def kernel(x_ref, t_ref, wwT_ref, whT_ref, o_ref, acc_ref):
        s = pl.program_id(1)

        @pl.when(s == 0)
        def _():
            acc_ref[...] = jnp.zeros_like(acc_ref)

        # Linearity: resize the DIFFERENCE once.  (TB, H, W) -> (TB*H, W) leading collapse (free).
        d2 = (x_ref[...].astype(compute_dtype)
              - t_ref[...].astype(compute_dtype)).reshape(tb * h, w)

        if needs_mask:
            # Ragged last block(s): zero the rows belonging to images >= b_total so the
            # boundary-padded (undefined) data contributes exactly 0 to the sum of squares.
            blk = pl.program_id(0) * steps + s
            valid_rows = jnp.clip(b_total - blk * tb, 0, tb) * h
            row = jax.lax.broadcasted_iota(jnp.int32, (tb * h, w), 0)
            d2 = jnp.where(row < valid_rows, d2, jnp.zeros_like(d2))

        # 1) W-resize of the whole block in ONE MXU matmul: (TB*H, W) @ (W, Wo).
        y = jnp.dot(d2, wwT_ref[...], preferred_element_type=jnp.float32)      # (TB*H, Wo) f32

        # 2) H-resize of the whole block in ONE MXU matmul.  The (TB, H, Wo) view is transposed
        #    on its last two dims (batched XLU transpose), leading-collapsed (free) to
        #    (TB*Wo, H) and contracted with the pre-transposed Wh^T.
        yT = jnp.swapaxes(y.reshape(tb, h, wo), 1, 2).reshape(tb * wo, h)
        z = jnp.dot(yT.astype(compute_dtype), whT_ref[...],
                    preferred_element_type=jnp.float32)                        # (TB*Wo, Ho) f32

        # Elementwise accumulation of squared residuals; the reduction is deferred.
        acc_ref[...] += z * z

        # Single cross-lane reduction + lane-dense (1,128) store only on the last step.
        @pl.when(s == pl.num_programs(1) - 1)
        def _():
            partial = jnp.sum(acc_ref[...]) * inv_count
            o_ref[...] = jnp.full(o_ref.shape, partial, dtype=o_ref.dtype)

    return kernel


def consistency_loss(inputs_nchw, targets_nchw, scale=0.5):
    """MSE( imresize(inputs, scale), imresize(targets, scale) ), mean over all elements."""
    n, c, h, w = inputs_nchw.shape
    ho = int(math.ceil(h * scale))
    wo = int(math.ceil(w * scale))
    b = n * c

    # bf16 inputs stream + matmul in bf16 (f32 accumulation); everything else computes in f32.
    if inputs_nchw.dtype == jnp.bfloat16 and targets_nchw.dtype == jnp.bfloat16:
        compute_dtype = jnp.bfloat16
    else:
        compute_dtype = jnp.float32

    # Resize matrices, pre-transposed so both in-kernel contractions are plain (M,K)@(K,N) dots.
    wwT = jnp.asarray(resize_matrix(w, wo, scale).T, dtype=compute_dtype)      # (W, Wo)
    whT = jnp.asarray(resize_matrix(h, ho, scale).T, dtype=compute_dtype)      # (H, Ho)

    # No astype / no concatenate in the wrapper: exactly one HBM pass over x and t.
    x = inputs_nchw.reshape(b, h, w)
    t = targets_nchw.reshape(b, h, w)
    x_isz = jnp.dtype(x.dtype).itemsize
    t_isz = jnp.dtype(t.dtype).itemsize
    c_isz = jnp.dtype(compute_dtype).itemsize

    # ---- generation-aware tiling: as many images per grid step as the VMEM budget allows ----
    vmem_bytes, n_cores = _tpu_hw()
    vmem_limit = int(min(3 * vmem_bytes // 4, 100 * 2 ** 20))    # ~96 MiB v5e/v6e, ~48 MiB v7x
    vmem_limit = max(vmem_limit, 32 * 2 ** 20)

    per_img = (2 * h * w * (x_isz + t_isz)            # x, t blocks (double-buffered)
               + 2 * h * w * c_isz                    # difference d
               + 2 * h * wo * 4 + h * wo * c_isz      # y + transposed / cast copies
               + 2 * wo * ho * 4)                     # z + accumulator
    fixed = 4 * (h * ho + w * wo) * c_isz + (6 << 20)             # weights (dbl-buffered) + headroom
    tb = int(max(1, min(b, (vmem_limit - fixed) // per_img)))

    blocks = -(-b // tb)
    nsplit = 2 if (n_cores >= 2 and blocks >= 2) else 1           # shard batch over 2 TCs only if present
    steps = -(-blocks // nsplit)
    needs_mask = (nsplit * steps * tb != b)                       # ragged coverage handled in-kernel

    inv_count = 1.0 / float(b * ho * wo)
    kernel = _make_kernel(inv_count, b, tb, h, w, ho, wo, steps, compute_dtype, needs_mask)

    def img_block(cc, s):
        # Clamp so over-covering grid steps re-read a valid block (their contribution is masked).
        return (jnp.minimum(cc * steps + s, blocks - 1), 0, 0)

    flops = 2 * b * h * w * wo + 2 * b * wo * h * ho + 3 * b * ho * wo
    bytes_accessed = b * h * w * (x_isz + t_isz) + (h * ho + w * wo) * c_isz + nsplit * 128 * 4

    out = pl.pallas_call(
        kernel,
        out_shape=jax.ShapeDtypeStruct((nsplit, 128), jnp.float32),
        grid=(nsplit, steps),
        in_specs=[
            pl.BlockSpec((tb, h, w), img_block),
            pl.BlockSpec((tb, h, w), img_block),
            pl.BlockSpec((w, wo), lambda cc, s: (0, 0)),
            pl.BlockSpec((h, ho), lambda cc, s: (0, 0)),
        ],
        out_specs=pl.BlockSpec((1, 128), lambda cc, s: (cc, 0)),
        scratch_shapes=[pltpu.VMEM((tb * wo, ho), jnp.float32)],
        compiler_params=pltpu.CompilerParams(
            dimension_semantics=("parallel", "arbitrary"),
            vmem_limit_bytes=vmem_limit),
        cost_estimate=pl.CostEstimate(flops=int(flops), transcendentals=0,
                                      bytes_accessed=int(bytes_accessed)),
    )(x, t, wwT, whT)

    return jnp.sum(out[:, 0])


def _reference_loss(inputs_nchw, targets_nchw, scale=0.5):
    """Pure-JAX reference (resize both, then MSE) for a silent correctness check."""
    n, c, h, w = inputs_nchw.shape
    ho = int(math.ceil(h * scale))
    wo = int(math.ceil(w * scale))
    wh = jnp.asarray(resize_matrix(h, ho, scale))
    ww = jnp.asarray(resize_matrix(w, wo, scale))
    x = inputs_nchw.reshape(n * c, h, w).astype(jnp.float32)
    t = targets_nchw.reshape(n * c, h, w).astype(jnp.float32)
    xr = jnp.einsum("oh,bhw,pw->bop", wh, x, ww, precision=jax.lax.Precision.HIGHEST)
    tr = jnp.einsum("oh,bhw,pw->bop", wh, t, ww, precision=jax.lax.Precision.HIGHEST)
    return jnp.mean((xr - tr) ** 2)


if __name__ == "__main__":
    key = jax.random.PRNGKey(0)
    k1, k2 = jax.random.split(key)
    # Small NCHW shapes consistent with an image-consistency loss.
    inputs = jax.random.normal(k1, (2, 4, 16, 16), dtype=jnp.float32)
    targets = jax.random.normal(k2, (2, 4, 16, 16), dtype=jnp.float32)

    loss = jax.block_until_ready(consistency_loss(inputs, targets, scale=0.5))
    ref = jax.block_until_ready(_reference_loss(inputs, targets, scale=0.5))

    # The kernel resizes (x - t) once (linearity) so rounding differs slightly from the
    # resize-both reference; tolerance reflects f32 reorder error only.
    if not bool(jnp.allclose(loss, ref, rtol=1e-4, atol=1e-6)):
        raise AssertionError(f"Pallas loss {loss} != reference {ref}")

    print("KERNEL_OK")
</pallas_src>

<mosaic_0001>
module attributes {stable_mosaic.version = 11 : i64} {
  func.func @kernel(%arg0: i32, %arg1: i32, %arg2: memref<8x16x16xf32, #tpu.memory_space<vmem>>, %arg3: memref<8x16x16xf32, #tpu.memory_space<vmem>>, %arg4: memref<16x8xf32, #tpu.memory_space<vmem>>, %arg5: memref<16x8xf32, #tpu.memory_space<vmem>>, %arg6: memref<1x128xf32, #tpu.memory_space<vmem>>, %arg7: memref<64x8xf32, #tpu.memory_space<vmem>>) attributes {dimension_semantics = [#tpu.dimension_semantics<parallel>, #tpu.dimension_semantics<arbitrary>], iteration_bounds = array<i64: 1, 1>, scalar_prefetch = 0 : i64, scratch_operands = 1 : i64, tpu.core_type = #tpu.core_type<tc>, window_params = [{transform_indices = @transform_0, window_bounds = array<i64: 8, 16, 16>}, {transform_indices = @transform_1, window_bounds = array<i64: 8, 16, 16>}, {pipeline_mode = #tpu.pipeline_mode<synchronous>, transform_indices = @transform_2, window_bounds = array<i64: 16, 8>}, {pipeline_mode = #tpu.pipeline_mode<synchronous>, transform_indices = @transform_3, window_bounds = array<i64: 16, 8>}, {transform_indices = @transform_4, window_bounds = array<i64: 1, 128>}]} {
    %c0_i32 = arith.constant 0 : i32
    %0 = arith.cmpi eq, %arg1, %c0_i32 : i32
    %1 = arith.extui %0 : i1 to i32
    %c0_i32_0 = arith.constant 0 : i32
    %2 = arith.cmpi ne, %1, %c0_i32_0 : i32
    scf.if %2 {
      %cst_17 = arith.constant 0.000000e+00 : f32
      %21 = vector.broadcast %cst_17 : f32 to vector<64x8xf32>
      %c0_18 = arith.constant 0 : index
      %c0_19 = arith.constant 0 : index
      %22 = vector.load %arg7[%c0_18, %c0_19] : memref<64x8xf32, #tpu.memory_space<vmem>>, vector<64x8xf32>
      tpu.vector_store %arg7[%c0_18, %c0_19], %21 {strides = array<i32>} : memref<64x8xf32, #tpu.memory_space<vmem>>, vector<64x8xf32>,
    } else {
    }
    %c0 = arith.constant 0 : index
    %c0_1 = arith.constant 0 : index
    %c0_2 = arith.constant 0 : index
    %3 = vector.load %arg2[%c0, %c0_1, %c0_2] : memref<8x16x16xf32, #tpu.memory_space<vmem>>, vector<8x16x16xf32>
    %c0_3 = arith.constant 0 : index
    %c0_4 = arith.constant 0 : index
    %c0_5 = arith.constant 0 : index
    %4 = vector.load %arg3[%c0_3, %c0_4, %c0_5] : memref<8x16x16xf32, #tpu.memory_space<vmem>>, vector<8x16x16xf32>
    %5 = arith.subf %3, %4 : vector<8x16x16xf32>
    %6 = vector.shape_cast %5 : vector<8x16x16xf32> to vector<128x16xf32>
    %c0_6 = arith.constant 0 : index
    %c0_7 = arith.constant 0 : index
    %7 = vector.load %arg4[%c0_6, %c0_7] : memref<16x8xf32, #tpu.memory_space<vmem>>, vector<16x8xf32>
    %cst = arith.constant dense<0.000000e+00> : vector<128x8xf32>
    %8 = tpu.matmul %6, %7, %cst {dimension_numbers = #tpu.dot_dimension_numbers<[1], [0], [0], [1], [0, 0, 1, 1], [], []>} : vector<128x16xf32>, vector<16x8xf32>, vector<128x8xf32> -> vector<128x8xf32>
    %9 = vector.shape_cast %8 : vector<128x8xf32> to vector<8x16x8xf32>
    %10 = tpu.transpose %9, [0, 2, 1] : vector<8x16x8xf32> -> vector<8x8x16xf32>
    %11 = vector.shape_cast %10 : vector<8x8x16xf32> to vector<64x16xf32>
    %c0_8 = arith.constant 0 : index
    %c0_9 = arith.constant 0 : index
    %12 = vector.load %arg5[%c0_8, %c0_9] : memref<16x8xf32, #tpu.memory_space<vmem>>, vector<16x8xf32>
    %cst_10 = arith.constant dense<0.000000e+00> : vector<64x8xf32>
    %13 = tpu.matmul %11, %12, %cst_10 {dimension_numbers = #tpu.dot_dimension_numbers<[1], [0], [0], [1], [0, 0, 1, 1], [], []>} : vector<64x16xf32>, vector<16x8xf32>, vector<64x8xf32> -> vector<64x8xf32>
    %c0_11 = arith.constant 0 : index
    %c0_12 = arith.constant 0 : index
    %14 = vector.load %arg7[%c0_11, %c0_12] : memref<64x8xf32, #tpu.memory_space<vmem>>, vector<64x8xf32>
    %15 = arith.mulf %13, %13 : vector<64x8xf32>
    %16 = arith.addf %14, %15 : vector<64x8xf32>
    %c0_13 = arith.constant 0 : index
    %c0_14 = arith.constant 0 : index
    %17 = vector.load %arg7[%c0_13, %c0_14] : memref<64x8xf32, #tpu.memory_space<vmem>>, vector<64x8xf32>
    tpu.vector_store %arg7[%c0_13, %c0_14], %16 {strides = array<i32>} : memref<64x8xf32, #tpu.memory_space<vmem>>, vector<64x8xf32>,
    %c0_i32_15 = arith.constant 0 : i32
    %18 = arith.cmpi eq, %arg1, %c0_i32_15 : i32
    %19 = arith.extui %18 : i1 to i32
    %c0_i32_16 = arith.constant 0 : i32
    %20 = arith.cmpi ne, %19, %c0_i32_16 : i32
    scf.if %20 {
      %c0_17 = arith.constant 0 : index
      %c0_18 = arith.constant 0 : index
      %21 = vector.load %arg7[%c0_17, %c0_18] : memref<64x8xf32, #tpu.memory_space<vmem>>, vector<64x8xf32>
      %22 = vector.shape_cast %21 : vector<64x8xf32> to vector<1x64x8xf32>
      %cst_19 = arith.constant dense<0.000000e+00> : vector<1xf32>
      %23 = vector.multi_reduction <add>, %22, %cst_19 [1, 2] : vector<1x64x8xf32> to vector<1xf32>
      %24 = vector.shape_cast %23 : vector<1xf32> to vector<1x1x1xf32>
      %25 = vector.extract %24[0, 0, 0] : f32 from vector<1x1x1xf32>
      %cst_20 = arith.constant 0.001953125 : f32
      %26 = arith.mulf %25, %cst_20 : f32
      %27 = vector.broadcast %26 : f32 to vector<1x128xf32>
      %c0_21 = arith.constant 0 : index
      %c0_22 = arith.constant 0 : index
      %28 = vector.load %arg6[%c0_21, %c0_22] : memref<1x128xf32, #tpu.memory_space<vmem>>, vector<1x128xf32>
      tpu.vector_store %arg6[%c0_21, %c0_22], %27 {strides = array<i32>} : memref<1x128xf32, #tpu.memory_space<vmem>>, vector<1x128xf32>,
    } else {
    }
    return
  }
  func.func @transform_0(%arg0: i32, %arg1: i32) -> (i32, i32, i32) {
    %c1_i32 = arith.constant 1 : i32
    %0 = arith.muli %arg0, %c1_i32 : i32
    %1 = arith.addi %0, %arg1 : i32
    %c0_i32 = arith.constant 0 : i32
    %2 = arith.minsi %1, %c0_i32 : i32
    %c0_i32_0 = arith.constant 0 : i32
    %c0_i32_1 = arith.constant 0 : i32
    %c0_i32_2 = arith.constant 0 : i32
    return %2, %c0_i32_0, %c0_i32_1 : i32, i32, i32
  }
  func.func @transform_1(%arg0: i32, %arg1: i32) -> (i32, i32, i32) {
    %c1_i32 = arith.constant 1 : i32
    %0 = arith.muli %arg0, %c1_i32 : i32
    %1 = arith.addi %0, %arg1 : i32
    %c0_i32 = arith.constant 0 : i32
    %2 = arith.minsi %1, %c0_i32 : i32
    %c0_i32_0 = arith.constant 0 : i32
    %c0_i32_1 = arith.constant 0 : i32
    %c0_i32_2 = arith.constant 0 : i32
    return %2, %c0_i32_0, %c0_i32_1 : i32, i32, i32
  }
  func.func @transform_2(%arg0: i32, %arg1: i32) -> (i32, i32) {
    %c0_i32 = arith.constant 0 : i32
    %c0_i32_0 = arith.constant 0 : i32
    %c0_i32_1 = arith.constant 0 : i32
    return %c0_i32, %c0_i32_0 : i32, i32
  }
  func.func @transform_3(%arg0: i32, %arg1: i32) -> (i32, i32) {
    %c0_i32 = arith.constant 0 : i32
    %c0_i32_0 = arith.constant 0 : i32
    %c0_i32_1 = arith.constant 0 : i32
    return %c0_i32, %c0_i32_0 : i32, i32
  }
  func.func @transform_4(%arg0: i32, %arg1: i32) -> (i32, i32) {
    %c0_i32 = arith.constant 0 : i32
    %c0_i32_0 = arith.constant 0 : i32
    return %arg0, %c0_i32 : i32, i32
  }
}

</mosaic_0001>

<bundles_post_ra>
// kernel: tpu_custom_call.1
= control target key start
LH: loop header
LB: loop body
LE: loop exit
PB: predicated region body
PF: predicated region fallthrough
CT: control target
= control target key end

     0   :  { %9 = vsyncpa [#allocation4], 0  ;;  %s1232_s0 = inlined_call_operand.hbm [shape: f32[8,16,16], index: 0, kind: input, shape index: {}]   ;;  %s1233_s1 = inlined_call_operand.hbm [shape: f32[8,16,16], index: 1, kind: input, shape index: {}]   ;;  %s1234_s2 = inlined_call_operand.hbm [shape: f32[16,8], index: 2, kind: input, shape index: {}]   ;;  %s1235_s3 = inlined_call_operand.hbm [shape: f32[16,8], index: 3, kind: input, shape index: {}]   ;;  %s1236_s4 = inlined_call_operand.hbm [shape: f32[1,128], index: 4, kind: output, shape index: {}]  }
   0x1   :  { %10 = vsyncpa [#allocation7], 0 }
   0x2   :  { %11 = vsyncpa [#allocation10], 0 }
   0x3   :  { %12 = vsyncpa [#allocation5], 0  ;;  %s1065_s15 = smov [#allocation6]   ;;  %s1066_s17 = smov [#allocation3]  }
   0x4   :  { %s44_s16 = sshll.u32 %s1065_s15, 4  ;;  %s25_s18 = sshll.u32 %s1066_s17, 4  ;;  %s45_s16 = int_to_ptr.vmem [resolvable:$true] %s44_s16  ;;  %s1098_s18 = int_to_ptr.vmem [resolvable:$true] %s25_s18 }
   0x5   :  { %s947_s21 = scalar_lea.hbm %s1233_s1, 2048 }
   0x6   :  { %p948_p0 = scmp.ne.s32.totalorder %s1233_s1, %s947_s21  ;;  %p951_p1 = scmp.lt.u32.totalorder %s947_s21, %s1233_s1 }
   0x8   :  { %p953_p2 = pnand %p951_p1, %p948_p0 }
   0xa   :  { %956 = shalt.err (!%p953_p2)
}
   0xb   :  { %s957_s26 = scalar_lea.vmem %s45_s16, 2048  ;;  %p962_p4 = scmp.lt.s32.totalorder %s45_s16, %s45_s16 }
   0xc   :  { %p958_p3 = scmp.ne.s32.totalorder %s45_s16, %s957_s26  ;;  %p963_p5 = scmp.lt.s32.totalorder %s957_s26, %s957_s26 }
   0xe   :  { %p964_p6 = por %p963_p5, %p962_p4 }
  0x10   :  { %p965_p7 = pnand %p964_p6, %p958_p3 }
  0x12   :  { %968 = shalt.err (!%p965_p7)
}
  0x13   :  { %s1067_s27 = smov 128   ;;  %s1068_s28 = smov 8  }
  0x14   :  { %50 = dma.hbm_to_vmem [thread:$0]  %s1233_s1, 2048, %s45_s16, [#allocation7], %s1067_s27, %s1067_s27, %s1068_s28  }
  0x15   :  { %s969_s7 = scalar_lea.hbm %s1232_s0, 2048 }
  0x16   :  { %p970_p8 = scmp.ne.s32.totalorder %s1232_s0, %s969_s7  ;;  %p973_p9 = scmp.lt.u32.totalorder %s969_s7, %s1232_s0 }
  0x18   :  { %p975_p10 = pnand %p973_p9, %p970_p8 }
  0x1a   :  { %978 = shalt.err (!%p975_p10)
}
  0x1b   :  { %s979_s12 = scalar_lea.vmem %s1098_s18, 2048  ;;  %p984_p12 = scmp.lt.s32.totalorder %s1098_s18, %s1098_s18 }
  0x1c   :  { %p980_p11 = scmp.ne.s32.totalorder %s1098_s18, %s979_s12  ;;  %p985_p13 = scmp.lt.s32.totalorder %s979_s12, %s979_s12 }
  0x1e   :  { %p986_p0 = por %p985_p13, %p984_p12 }
  0x20   :  { %p987_p1 = pnand %p986_p0, %p980_p11 }
  0x22   :  { %990 = shalt.err (!%p987_p1)
}
  0x23   :  { %31 = dma.hbm_to_vmem [thread:$0]  %s1232_s0, 2048, %s1098_s18, [#allocation4], %s1067_s27, %s1067_s27, %s1068_s28  }
  0x24   :  { %s1069_s14 = smov [#allocation8]   ;;  %s1070_s16 = smov [#allocation9]  }
  0x25   :  { %s56_s15 = sshll.u32 %s1069_s14, 4  ;;  %s68_s17 = sshll.u32 %s1070_s16, 4  ;;  %s57_s15 = int_to_ptr.vmem [resolvable:$true] %s56_s15  ;;  %s1135_s17 = int_to_ptr.vmem [resolvable:$true] %s68_s17 }
  0x26   :  { %s991_s21 = scalar_lea.hbm %s1234_s2, 256 }
  0x27   :  { %p992_p2 = scmp.ne.s32.totalorder %s1234_s2, %s991_s21  ;;  %p995_p3 = scmp.lt.u32.totalorder %s991_s21, %s1234_s2 }
  0x29   :  { %p997_p4 = pnand %p995_p3, %p992_p2 }
  0x2b   :  { %1000 = shalt.err (!%p997_p4)
}
  0x2c   :  { %s1001_s0 = scalar_lea.vmem %s57_s15, 256  ;;  %p1006_p6 = scmp.lt.s32.totalorder %s57_s15, %s57_s15 }
  0x2d   :  { %p1002_p5 = scmp.ne.s32.totalorder %s57_s15, %s1001_s0  ;;  %p1007_p7 = scmp.lt.s32.totalorder %s1001_s0, %s1001_s0 }
  0x2f   :  { %p1008_p8 = por %p1007_p7, %p1006_p6 }
  0x31   :  { %p1009_p9 = pnand %p1008_p8, %p1002_p5 }
  0x33   :  { %1012 = shalt.err (!%p1009_p9)
}
  0x34   :  { %62 = dma.hbm_to_vmem [thread:$0]  %s1234_s2, 256, %s57_s15, [#allocation7], %s1067_s27, %s1067_s27, %s1068_s28  }
  0x35   :  { %s1013_s5 = scalar_lea.hbm %s1235_s3, 256 }
  0x36   :  { %p1014_p10 = scmp.ne.s32.totalorder %s1235_s3, %s1013_s5  ;;  %p1017_p11 = scmp.lt.u32.totalorder %s1013_s5, %s1235_s3 }
  0x38   :  { %p1019_p12 = pnand %p1017_p11, %p1014_p10 }
  0x3a   :  { %1022 = shalt.err (!%p1019_p12)
}
  0x3b   :  { %s1023_s10 = scalar_lea.vmem %s1135_s17, 256  ;;  %p1028_p0 = scmp.lt.s32.totalorder %s1135_s17, %s1135_s17 }
  0x3c   :  { %p1024_p13 = scmp.ne.s32.totalorder %s1135_s17, %s1023_s10  ;;  %p1029_p1 = scmp.lt.s32.totalorder %s1023_s10, %s1023_s10 }
  0x3e   :  { %p1030_p2 = por %p1029_p1, %p1028_p0 }
  0x40   :  { %p1031_p3 = pnand %p1030_p2, %p1024_p13 }
  0x42   :  { %1034 = shalt.err (!%p1031_p3)
}
  0x43   :  { %74 = dma.hbm_to_vmem [thread:$0]  %s1235_s3, 256, %s1135_s17, [#allocation10], %s1067_s27, %s1067_s27, %s1068_s28  }
  0x44   :  { %1057 = dma.done.wait [#allocation4], 2048  }
  0x45   :  { %1058 = vsyncadd [#allocation4], 4294965248 }
  0x46   :  { %1059 = dma.done.wait [#allocation7], 2304  }
  0x47   :  { %1060 = vsyncadd [#allocation7], 4294964992 }
  0x48   :  { %1061 = dma.done.wait [#allocation10], 256  }
  0x49   :  { %1062 = vsyncadd [#allocation10], 4294967040  ;;  %v156_v0 = vld [vmem:[#allocation8] sm:$0xff]  ;;  %v157_v1 = vld [vmem:[#allocation8 + $0x8] sm:$0xff]  ;;  %vm158_vm0 = vcmask 130048   ;;  %vm99_vm1 = vcmask 64512  }
  0x4a   :  { %v108_v2 = vld [vmem:[#allocation3] sm:$0xff]  ;;  %v927_v3 = vpack.c.bf16 %v157_v1, %v156_v0  ;;  %v109_v5 = vld [vmem:[#allocation3 + $0x8] sm:$0xff]  ;;  %v110_v8 = vld [vmem:[#allocation3 + $0x10] sm:$0xff]  ;;  %s1072_s3 = smov [#allocation11]  }
  0x4b   :  { %v124_v4 = vld [vmem:[#allocation6] sm:$0xff]  ;;  %v125_v6 = vld [vmem:[#allocation6 + $0x8] sm:$0xff]  ;;  %v126_v9 = vld [vmem:[#allocation6 + $0x10] sm:$0xff]  ;;  %s816_s27 = sshll.u32 %s1072_s3, 4  ;;  %s817_s27 = int_to_ptr.vmem [resolvable:$true] %s816_s27 }
  0x4c   :  { %v140_v7 = vsub.f32 %v108_v2, %v124_v4  ;;  %928 = vmatprep.subr.bf16.mxu0 %v927_v3  ;;  %v141_v10 = vsub.f32 %v109_v5, %v125_v6  ;;  %935 = vmatprep.subr.bf16.mxu1 %v927_v3  ;;  %v142_v11 = vsub.f32 %v110_v8, %v126_v9  ;;  %v111_v12 = vld [vmem:[#allocation3 + $0x18] sm:$0xff]  ;;  %v112_v14 = vld [vmem:[#allocation3 + $0x20] sm:$0xff]  ;;  %v113_v17 = vld [vmem:[#allocation3 + $0x28] sm:$0xff]  ;;  %v1071_v6 = vmov 0.0   ;;  %s1035_s1 = scalar_lea.vmem %s817_s27, 16  ;;  %s1039_s13 = scalar_lea.vmem %s817_s27, 32 }
  0x4d   :  { %930 = vmatpush3.bf16.msra.mxu0 %v927_v3  ;;  %v127_v13 = vld [vmem:[#allocation6 + $0x18] sm:$0xff]  ;;  %v128_v15 = vld [vmem:[#allocation6 + $0x20] sm:$0xff]  ;;  %936 = vmatpush3.bf16.msra.mxu1 %v927_v3  ;;  %v129_v18 = vld [vmem:[#allocation6 + $0x28] sm:$0xff]  ;;  %101 = vst.msk [vmem:[#allocation2 + $0x8] sm:$0xff] %vm99_vm1, %v1071_v6  ;;  %p1036_p4 = scmp.ne.s32.totalorder %s817_s27, %s1035_s1  ;;  %p1040_p5 = scmp.lt.s32.totalorder %s817_s27, %s817_s27 }
  0x4e   :  { %887 = vmatprep.mubr.msk.f32.mxu0 %vm158_vm0, %v140_v7  ;;  %v143_v16 = vsub.f32 %v111_v12, %v127_v13  ;;  %v144_v19 = vsub.f32 %v112_v14, %v128_v15  ;;  %v114_v20 = vld [vmem:[#allocation3 + $0x30] sm:$0xff]  ;;  %v120_v22 = vld [vmem:[#allocation3 + $0x60] sm:$0xff]  ;;  %v121_v24 = vld [vmem:[#allocation3 + $0x68] sm:$0xff]  ;;  %v145_v31 = vsub.f32 %v113_v17, %v129_v18  ;;  %100 = vst.msk [vmem:[#allocation2] sm:$0xff] %vm99_vm1, %v1071_v6  ;;  %p1041_p6 = scmp.lt.s32.totalorder %s1039_s13, %s1035_s1 }
  0x4f   :  { %v130_v21 = vld [vmem:[#allocation6 + $0x30] sm:$0xff]  ;;  %v136_v23 = vld [vmem:[#allocation6 + $0x60] sm:$0xff]  ;;  %v137_v25 = vld [vmem:[#allocation6 + $0x68] sm:$0xff]  ;;  %102 = vst.msk [vmem:[#allocation2 + $0x10] sm:$0xff] %vm99_vm1, %v1071_v6 }
  0x50   :  { %888 = vmatmul.mubr.msk.f32.vlgmr.msra.gmra.mrb[0].mxu0 %vm158_vm0, %v141_v10  ;;  %v152_v26 = vsub.f32 %v120_v22, %v136_v23  ;;  %v153_v27 = vsub.f32 %v121_v24, %v137_v25  ;;  %v122_v28 = vld [vmem:[#allocation3 + $0x70] sm:$0xff]  ;;  %v123_v30 = vld [vmem:[#allocation3 + $0x78] sm:$0xff]  ;;  %v146_v34 = vsub.f32 %v114_v20, %v130_v21  ;;  %v116_v37 = vld [vmem:[#allocation3 + $0x40] sm:$0xff]  ;;  %103 = vst.msk [vmem:[#allocation2 + $0x18] sm:$0xff] %vm99_vm1, %v1071_v6  ;;  %p1042_p7 = por %p1041_p6, %p1040_p5 }
  0x51   :  { %890 = vmatprep.mubr.msk.f32.mxu0 %vm158_vm0, %v142_v11  ;;  %v138_v29 = vld [vmem:[#allocation6 + $0x70] sm:$0xff]  ;;  %v139_v33 = vld [vmem:[#allocation6 + $0x78] sm:$0xff]  ;;  %v132_v38 = vld [vmem:[#allocation6 + $0x40] sm:$0xff]  ;;  %104 = vst.msk [vmem:[#allocation2 + $0x20] sm:$0xff] %vm99_vm1, %v1071_v6 }
  0x52   :  { %v154_v32 = vsub.f32 %v122_v28, %v138_v29  ;;  %v115_v35 = vld [vmem:[#allocation3 + $0x38] sm:$0xff]  ;;  %905 = vmatprep.mubr.msk.f32.mxu1 %vm158_vm0, %v152_v26  ;;  %v155_v39 = vsub.f32 %v123_v30, %v139_v33  ;;  %v148_v41 = vsub.f32 %v116_v37, %v132_v38  ;;  %v117_v42 = vld [vmem:[#allocation3 + $0x48] sm:$0xff]  ;;  %v118_v44 = vld [vmem:[#allocation3 + $0x50] sm:$0xff]  ;;  %105 = vst.msk [vmem:[#allocation2 + $0x28] sm:$0xff] %vm99_vm1, %v1071_v6  ;;  %p1043_p8 = pnand %p1042_p7, %p1036_p4 }
  0x53   :  { %v131_v36 = vld [vmem:[#allocation6 + $0x38] sm:$0xff]  ;;  %906 = vmatmul.mubr.msk.f32.vlgmr.msra.gmra.mrb[0].mxu1 %vm158_vm0, %v153_v27  ;;  %v133_v43 = vld [vmem:[#allocation6 + $0x48] sm:$0xff]  ;;  %v134_v45 = vld [vmem:[#allocation6 + $0x50] sm:$0xff]  ;;  %106 = vst.msk [vmem:[#allocation2 + $0x30] sm:$0xff] %vm99_vm1, %v1071_v6 }
  0x54   :  { %891 = vmatmul.mubr.msk.f32.gmra.mrb[2].mxu0 %vm158_vm0, %v143_v16  ;;  %908 = vmatprep.mubr.msk.f32.mxu1 %vm158_vm0, %v154_v32  ;;  %v147_v40 = vsub.f32 %v115_v35, %v131_v36  ;;  %v149_v46 = vsub.f32 %v117_v42, %v133_v43  ;;  %v150_v47 = vsub.f32 %v118_v44, %v134_v45  ;;  %v119_v48 = vld [vmem:[#allocation3 + $0x58] sm:$0xff]  ;;  %v608_v51 = vld [vmem:[#allocation9] sm:$0xff]  ;;  %v740_v16 = vld [vmem:[#allocation2 + $0x8] sm:$0xff] }
  0x55   :  { %893 = vmatprep.mubr.msk.f32.mxu0 %vm158_vm0, %v144_v19  ;;  %v135_v49 = vld [vmem:[#allocation6 + $0x58] sm:$0xff]  ;;  %107 = vst.msk [vmem:[#allocation2 + $0x38] sm:$0xff] %vm99_vm1, %v1071_v6  ;;  %v739_v19 = vld [vmem:[#allocation2] sm:$0xff] }
  0x56   :  { %v151_v50 = vsub.f32 %v119_v48, %v135_v49  ;;  %v609_v52 = vld [vmem:[#allocation9 + $0x8] sm:$0xff]  ;;  %v741_v27 = vld [vmem:[#allocation2 + $0x10] sm:$0xff] }
  0x57   :  { %909 = vmatmul.mubr.msk.f32.gmra.mrb[2].mxu1 %vm158_vm0, %v155_v39  ;;  %v931_v53 = vpack.c.bf16 %v609_v52, %v608_v51  ;;  %v742_v24 = vld [vmem:[#allocation2 + $0x18] sm:$0xff] }
  0x58   :  { %894 = vmatmul.mubr.msk.f32.gmra.mrb[4].mxu0 %vm158_vm0, %v145_v31  ;;  %v743_v37 = vld [vmem:[#allocation2 + $0x20] sm:$0xff] }
  0x59   :  { %896 = vmatprep.mubr.msk.f32.mxu0 %vm158_vm0, %v146_v34  ;;  %932 = vmatprep.subr.bf16.mxu1 %v931_v53  ;;  %v744_v34 = vld [vmem:[#allocation2 + $0x28] sm:$0xff] }
  0x5a   :  { %934 = vmatpush3.bf16.msra.mxu1 %v931_v53  ;;  %v745_v51 = vld [vmem:[#allocation2 + $0x30] sm:$0xff] }
  0x5c   :  { %897 = vmatmul.mubr.msk.f32.gmra.mrb[6].mxu0 %vm158_vm0, %v147_v40  ;;  %v746_v48 = vld [vmem:[#allocation2 + $0x38] sm:$0xff] }
  0x5d   :  { %899 = vmatprep.mubr.msk.f32.mxu0 %vm158_vm0, %v148_v41 }
  0x60   :  { %900 = vmatmul.mubr.msk.f32.gmra.mrb[8].mxu0 %vm158_vm0, %v149_v46 }
  0x61   :  { %902 = vmatprep.mubr.msk.f32.mxu0 %vm158_vm0, %v150_v47 }
  0x64   :  { %903 = vmatmul.mubr.msk.f32.gmra.mrb[10].mxu0 %vm158_vm0, %v151_v50 }
 0x123   :  { %v889_v54 = vpop.f32.mrb[0].mxu0 }
 0x124   :  { %v273_v55 = vpop.f32.mrb[1].mxu0 }
 0x125   :  { %352 = vxpose.xlu0.b32.start [1/2] (short) (narrow) %v273_v55, 8 }
 0x126   :  { %v907_v58 = vpop.f32.mrb[0].mxu1 }
 0x127   :  { %v892_v56 = vpop.f32.mrb[2].mxu0  ;;  %v333_v59 = vpop.f32.mrb[1].mxu1 }
 0x128   :  { %v283_v57 = vpop.f32.mrb[3].mxu0 }
 0x129   :  { %353 = vxpose.xlu0.b32.end [2/2] (short) (narrow) %v889_v54, 8  ;;  %384 = vxpose.xlu1.b32.start [1/2] (short) (narrow) %v283_v57, 8 }
 0x12a   :  { %v910_v62 = vpop.f32.mrb[2].mxu1 }
 0x12b   :  { %v895_v60 = vpop.f32.mrb[4].mxu0  ;;  %v343_v63 = vpop.f32.mrb[3].mxu1 }
 0x12c   :  { %v293_v61 = vpop.f32.mrb[5].mxu0 }
 0x12d   :  { %385 = vxpose.xlu1.b32.end [2/2] (short) (narrow) %v892_v56, 8  ;;  %416 = vxpose.xlu0.b32.start [1/2] (short) (narrow) %v293_v61, 8 }
 0x12f   :  { %v898_v0 = vpop.f32.mrb[6].mxu0 }
 0x130   :  { %v303_v1 = vpop.f32.mrb[7].mxu0 }
 0x131   :  { %417 = vxpose.xlu0.b32.end [2/2] (short) (narrow) %v895_v60, 8  ;;  %448 = vxpose.xlu1.b32.start [1/2] (short) (narrow) %v303_v1, 8 }
 0x133   :  { %v901_v2 = vpop.f32.mrb[8].mxu0 }
 0x134   :  { %v313_v3 = vpop.f32.mrb[9].mxu0 }
 0x135   :  { %449 = vxpose.xlu1.b32.end [2/2] (short) (narrow) %v898_v0, 8  ;;  %480 = vxpose.xlu0.b32.start [1/2] (short) (narrow) %v313_v3, 8 }
 0x137   :  { %v904_v4 = vpop.f32.mrb[10].mxu0 }
 0x138   :  { %v323_v5 = vpop.f32.mrb[11].mxu0 }
 0x139   :  { %481 = vxpose.xlu0.b32.end [2/2] (short) (narrow) %v901_v2, 8  ;;  %512 = vxpose.xlu1.b32.start [1/2] (short) (narrow) %v323_v5, 8 }
 0x13d   :  { %544 = vxpose.xlu0.b32.start [1/2] (short) (narrow) %v333_v59, 8  ;;  %513 = vxpose.xlu1.b32.end [2/2] (short) (narrow) %v904_v4, 8 }
 0x141   :  { %545 = vxpose.xlu0.b32.end [2/2] (short) (narrow) %v907_v58, 8  ;;  %576 = vxpose.xlu1.b32.start [1/2] (short) (narrow) %v343_v63, 8 }
 0x145   :  { %577 = vxpose.xlu1.b32.end [2/2] (short) (narrow) %v910_v62, 8 }
 0x1a5   :  { %v368_v7 = vpop.trf.xlu0 }
 0x1a6   :  { %915 = vmatprep.mubr.msk.f32.mxu1 %vm158_vm0, %v368_v7 }
 0x1a9   :  { %v400_v8 = vpop.trf.xlu1 }
 0x1aa   :  { %916 = vmatmul.mubr.msk.f32.vlgmr.msra.gmra.mrb[4].mxu1 %vm158_vm0, %v400_v8 }
 0x1ad   :  { %v432_v9 = vpop.trf.xlu0 }
 0x1ae   :  { %918 = vmatprep.mubr.msk.f32.mxu1 %vm158_vm0, %v432_v9 }
 0x1b1   :  { %v464_v10 = vpop.trf.xlu1 }
 0x1b2   :  { %919 = vmatmul.mubr.msk.f32.gmra.mrb[6].mxu1 %vm158_vm0, %v464_v10 }
 0x1b5   :  { %v496_v11 = vpop.trf.xlu0 }
 0x1b6   :  { %921 = vmatprep.mubr.msk.f32.mxu1 %vm158_vm0, %v496_v11 }
 0x1b9   :  { %v528_v12 = vpop.trf.xlu1 }
 0x1ba   :  { %922 = vmatmul.mubr.msk.f32.gmra.mrb[8].mxu1 %vm158_vm0, %v528_v12 }
 0x1bd   :  { %v560_v13 = vpop.trf.xlu0 }
 0x1be   :  { %924 = vmatprep.mubr.msk.f32.mxu1 %vm158_vm0, %v560_v13 }
 0x1c1   :  { %v592_v14 = vpop.trf.xlu1 }
 0x1c2   :  { %925 = vmatmul.mubr.msk.f32.gmra.mrb[10].mxu1 %vm158_vm0, %v592_v14 }
 0x27d   :  { %v917_v15 = vpop.f32.mrb[4].mxu1 }
 0x27e   :  { %v748_v17 = vmul.f32 %v917_v15, %v917_v15  ;;  %v700_v18 = vpop.f32.mrb[5].mxu1 }
 0x27f   :  { %v747_v20 = vmul.f32 %v700_v18, %v700_v18 }
 0x280   :  { %v756_v21 = vadd.f32 %v748_v17, %v740_v16 }
 0x281   :  { %v755_v22 = vadd.f32 %v747_v20, %v739_v19 }
 0x282   :  { %765 = vst.msk [vmem:[#allocation2 + $0x8] sm:$0xff] %vm99_vm1, %v756_v21 }
 0x283   :  { %764 = vst.msk [vmem:[#allocation2] sm:$0xff] %vm99_vm1, %v755_v22 }
 0x285   :  { %v920_v23 = vpop.f32.mrb[6].mxu1 }
 0x286   :  { %v750_v25 = vmul.f32 %v920_v23, %v920_v23  ;;  %v710_v26 = vpop.f32.mrb[7].mxu1 }
 0x287   :  { %v749_v28 = vmul.f32 %v710_v26, %v710_v26 }
 0x288   :  { %v758_v29 = vadd.f32 %v750_v25, %v742_v24 }
 0x289   :  { %v757_v30 = vadd.f32 %v749_v28, %v741_v27  ;;  %v776_v32 = vld [vmem:[#allocation2 + $0x8] sm:$0xff] }
 0x28a   :  { %767 = vst.msk [vmem:[#allocation2 + $0x18] sm:$0xff] %vm99_vm1, %v758_v29  ;;  %v775_v31 = vld [vmem:[#allocation2] sm:$0xff]  ;;  %v784_v40 = vsel %vm99_vm1, %v776_v32, 0.0 }
 0x28b   :  { %766 = vst.msk [vmem:[#allocation2 + $0x10] sm:$0xff] %vm99_vm1, %v757_v30  ;;  %v783_v39 = vsel %vm99_vm1, %v775_v31, 0.0 }
 0x28c   :  { %v785_v44 = vadd.f32 %v784_v40, %v783_v39 }
 0x28d   :  { %v923_v33 = vpop.f32.mrb[8].mxu1 }
 0x28e   :  { %v752_v35 = vmul.f32 %v923_v33, %v923_v33  ;;  %v720_v36 = vpop.f32.mrb[9].mxu1 }
 0x28f   :  { %v751_v38 = vmul.f32 %v720_v36, %v720_v36 }
 0x290   :  { %v760_v41 = vadd.f32 %v752_v35, %v744_v34 }
 0x291   :  { %v759_v42 = vadd.f32 %v751_v38, %v743_v37  ;;  %v778_v46 = vld [vmem:[#allocation2 + $0x18] sm:$0xff] }
 0x292   :  { %769 = vst.msk [vmem:[#allocation2 + $0x28] sm:$0xff] %vm99_vm1, %v760_v41  ;;  %v777_v43 = vld [vmem:[#allocation2 + $0x10] sm:$0xff]  ;;  %v788_v54 = vsel %vm99_vm1, %v778_v46, 0.0 }
 0x293   :  { %768 = vst.msk [vmem:[#allocation2 + $0x20] sm:$0xff] %vm99_vm1, %v759_v42  ;;  %v786_v45 = vsel %vm99_vm1, %v777_v43, 0.0 }
 0x294   :  { %v787_v52 = vadd.f32 %v786_v45, %v785_v44 }
 0x295   :  { %v926_v47 = vpop.f32.mrb[10].mxu1 }
 0x296   :  { %v754_v49 = vmul.f32 %v926_v47, %v926_v47  ;;  %v730_v50 = vpop.f32.mrb[11].mxu1  ;;  %v789_v58 = vadd.f32 %v788_v54, %v787_v52 }
 0x297   :  { %v753_v53 = vmul.f32 %v730_v50, %v730_v50 }
 0x298   :  { %v762_v55 = vadd.f32 %v754_v49, %v746_v48 }
 0x299   :  { %v761_v56 = vadd.f32 %v753_v53, %v745_v51  ;;  %v780_v60 = vld [vmem:[#allocation2 + $0x28] sm:$0xff] }
 0x29a   :  { %771 = vst.msk [vmem:[#allocation2 + $0x38] sm:$0xff] %vm99_vm1, %v762_v55  ;;  %v779_v57 = vld [vmem:[#allocation2 + $0x20] sm:$0xff]  ;;  %v792_v62 = vsel %vm99_vm1, %v780_v60, 0.0 }
 0x29b   :  { %770 = vst.msk [vmem:[#allocation2 + $0x30] sm:$0xff] %vm99_vm1, %v761_v56  ;;  %v790_v59 = vsel %vm99_vm1, %v779_v57, 0.0 }
 0x29c   :  { %v791_v61 = vadd.f32 %v790_v59, %v789_v58 }
 0x29e   :  { %v793_v1 = vadd.f32 %v792_v62, %v791_v61 }
 0x2a1   :  { %v782_v0 = vld [vmem:[#allocation2 + $0x38] sm:$0xff] }
 0x2a2   :  { %v781_v63 = vld [vmem:[#allocation2 + $0x30] sm:$0xff]  ;;  %v796_v4 = vsel %vm99_vm1, %v782_v0, 0.0 }
 0x2a3   :  { %v794_v2 = vsel %vm99_vm1, %v781_v63, 0.0 }
 0x2a4   :  { %v795_v3 = vadd.f32 %v794_v2, %v793_v1 }
 0x2a6   :  { %v797_v5 = vadd.f32 %v796_v4, %v795_v3 }
 0x2a8   :  { %798 = vadd.xlane.f32.xlu0 %v797_v5 }
 0x335   :  { %v799_v6 = vpop.xlane.xlu0 %798 }
 0x336   :  { %v800_v7 = vrot.slane %v799_v6, 4 }
 0x338   :  { %v801_v8 = vadd.f32 %v800_v7, %v799_v6 }
 0x33a   :  { %v802_v9 = vrot.slane %v801_v8, 2 }
 0x33c   :  { %v803_v10 = vadd.f32 %v802_v9, %v801_v8 }
 0x33e   :  { %v804_v11 = vrot.slane %v803_v10, 1 }
 0x340   :  { %v805_v12 = vadd.f32 %v804_v11, %v803_v10 }
 0x342   :  { %937 = vpush %v805_v12 }
 0x373   :  { %s938_s28 = spop %937 }
 0x374   :  { %s807_s12 = smul.f32 0.001953125, %s938_s28 }
 0x376   :  { %v808_v13 = vstv %s807_s12 }
 0x377   :  { %809 = vst [vmem:[#allocation11] sm:$0x1] %v808_v13 }
 0x378   :  { %1046 = shalt.err (!%p1043_p8)
}
 0x379   :  { %s1047_s16 = scalar_lea.hbm %s1236_s4, 16 }
 0x37a   :  { %p1048_p9 = scmp.ne.s32.totalorder %s1236_s4, %s1047_s16  ;;  %p1051_p10 = scmp.lt.u32.totalorder %s1047_s16, %s1236_s4 }
 0x37c   :  { %p1053_p11 = pnand %p1051_p10, %p1048_p9 }
 0x37e   :  { %1056 = shalt.err (!%p1053_p11)
}
 0x37f   :  { %819 = dma.vmem_to_hbm [thread:$0]  %s817_s27, 16, %s1236_s4, [#allocation5]  }
 0x380   :  { %1063 = dma.done.wait [#allocation5], 16  }
 0x381   :  { %1064 = vsyncadd [#allocation5], 4294967280 }
 0x382   :  { %823 = vsyncpa [#allocation4], 1 }
 0x383   :  { %824 = vsyncpa [#allocation7], 1 }
 0x384   :  { %825 = vsyncpa [#allocation10], 1 }
 0x385   :  { %826 = vsyncpa [#allocation5], 1 }

</bundles_post_ra>
